<compile_context>
chip_gen: v7x
topology: tpu7x:2x2x1
jax: 0.10.0
libtpu: 0.0.40
codegen_flags: <defaults>
</compile_context>

<pallas_src>
import jax
import jax.numpy as jnp
from jax.experimental import pallas as pl
from jax.experimental.pallas import tpu as pltpu


_MIN_PALLAS_BYTES = 1 << 20                      # below this, jnp + XLA fusion wins
_LANE_CHOICES = (4096, 2048, 1024, 512, 256, 128)
_FALLBACK_LANES = 512                            # padded-fallback lane width


# ---------------- Pallas kernel (backward hot path) ----------------

def _neg_scale_kernel(neg_coeff_ref, g_ref, o_ref):
    # dx = (-coeff) * dy ; multiply in f32, cast once at the store.
    scale = neg_coeff_ref[0]                                  # f32 scalar from SMEM
    o_ref[...] = (g_ref[...].astype(jnp.float32) * scale).astype(o_ref.dtype)


# ---------------- Layout / tiling helpers ----------------

def _device_tuning():
    """(target_tile_bytes, vmem_limit_bytes) per TPU generation."""
    try:
        kind = jax.devices()[0].device_kind.lower()
    except Exception:
        kind = ""
    if "v5" in kind:
        # v5e scoped default is 16 MiB; 3 MiB tiles (4x live = 12 MiB) + headroom.
        return 3 * 1024 * 1024, 24 * 1024 * 1024
    if "v6" in kind:
        # ~86% of HBM roofline at ~4 MiB blocks; fits the 32 MiB scoped default.
        return 4 * 1024 * 1024, 32 * 1024 * 1024
    # v7x / unknown: bigger tiles amortize the ~0.35 us per-step overhead at
    # 3.2 TB/s; 44 MiB scoped limit stays under the 64 MiB/TC physical VMEM.
    return 6 * 1024 * 1024, 44 * 1024 * 1024


def _sublane_multiple(itemsize):
    # f32 -> 8, bf16 -> 16, int8/fp8 -> 32 (packed-row alignment).
    return max(8, 32 // max(1, itemsize))


def _as_lane_dense_2d(g):
    """Flatten to a 2D slab with a large, 128-multiple last dim.

    Returns (g2d, original_size, padded?).  If no lane choice divides the
    total size, the flat gradient is zero-padded to a multiple of 512 lanes so
    all stores stay unmasked and DMA stays contiguous.
    """
    total = g.size
    for lanes in _LANE_CHOICES:
        if total % lanes == 0:
            return g.reshape(total // lanes, lanes), total, False
    lanes = _FALLBACK_LANES
    pad = (-total) % lanes
    flat = jnp.pad(g.reshape(-1), (0, pad))
    return flat.reshape(-1, lanes), total, True


def _pick_row_tile(rows, cols, itemsize, tile_bytes):
    sub = _sublane_multiple(itemsize)
    if rows <= sub:
        return rows                                   # full-extent block is legal
    tr = max(sub, tile_bytes // max(1, cols * itemsize))
    tr = (tr // sub) * sub
    tr = min(tr, rows)
    # Ensure >= 2 grid steps so both v7x TensorCores participate.
    if rows >= 2 * sub and pl.cdiv(rows, tr) < 2:
        tr = max(sub, ((rows // 2) // sub) * sub)
    return tr


def _neg_scale(g, coeff):
    """dx = -coeff * g via a tiled, pipelined Pallas kernel (large g only)."""
    if g.size == 0:
        return g
    if g.nbytes < _MIN_PALLAS_BYTES:
        # Tiny: let XLA fuse the scalar multiply into the surrounding backward.
        return ((-coeff) * g.astype(jnp.float32)).astype(g.dtype)

    orig_shape = g.shape
    g2d, total, padded = _as_lane_dense_2d(g)
    rows, cols = g2d.shape
    itemsize = g2d.dtype.itemsize
    tile_bytes, vmem_limit = _device_tuning()
    tr = _pick_row_tile(rows, cols, itemsize, tile_bytes)
    neg_coeff = jnp.reshape(-coeff, (1,)).astype(jnp.float32)

    dx2d = pl.pallas_call(
        _neg_scale_kernel,
        out_shape=jax.ShapeDtypeStruct((rows, cols), g2d.dtype),
        grid=(pl.cdiv(rows, tr),),
        in_specs=[
            pl.BlockSpec(memory_space=pltpu.MemorySpace.SMEM),   # -coeff scalar
            pl.BlockSpec((tr, cols), lambda i: (i, 0)),          # gradient tile
        ],
        out_specs=pl.BlockSpec((tr, cols), lambda i: (i, 0)),
        input_output_aliases={1: 0},      # reuse the cotangent buffer for dx
        cost_estimate=pl.CostEstimate(
            flops=rows * cols,
            transcendentals=0,
            bytes_accessed=2 * rows * cols * itemsize,
        ),
        compiler_params=pltpu.CompilerParams(
            dimension_semantics=("parallel",),
            vmem_limit_bytes=vmem_limit,
        ),
    )(neg_coeff, g2d)

    if padded:
        return dx2d.reshape(-1)[:total].reshape(orig_shape)
    return dx2d.reshape(orig_shape)


# ---------------- custom_vjp wrapper (GradientReverseLayer) ----------------

@jax.custom_vjp
def _grl(x, coeff):
    # Forward: identity (y = x * 1.0) -> passthrough, zero HBM traffic.
    return x


def _grl_fwd(x, coeff):
    return x, coeff


def _grl_bwd(coeff, g):
    # dx = -coeff * dy ; coeff receives a zero cotangent (PyTorch returns None).
    return _neg_scale(g, coeff), jnp.zeros((), dtype=jnp.float32)


_grl.defvjp(_grl_fwd, _grl_bwd)


def gradient_reverse_layer(x, coeff=1.0):
    """GradientReverseLayer: y = x; d/dx = -coeff * dy. coeff may be traced."""
    coeff = jnp.asarray(coeff, dtype=jnp.float32)
    return _grl(x, coeff)


# ---------------- Demo / self-test ----------------

if __name__ == "__main__":
    key = jax.random.PRNGKey(0)
    kx, kw = jax.random.split(key)

    # Small NCHW activations, as the PyTorch module would see.
    x = jax.random.normal(kx, (2, 4, 16, 16), dtype=jnp.float32)
    w = jax.random.normal(kw, (2, 4, 16, 16), dtype=jnp.float32)

    # Forward: identity.
    y = jax.block_until_ready(gradient_reverse_layer(x, 1.0))
    assert y.shape == x.shape and y.dtype == x.dtype
    assert bool(jnp.allclose(y, x))

    # Backward on the small tensor (tiny -> fused jnp fast path).
    coeff = 2.5
    loss = lambda a: jnp.sum(gradient_reverse_layer(a, coeff) * w)
    dx = jax.block_until_ready(jax.grad(loss)(x))
    assert bool(jnp.allclose(dx, -coeff * w, rtol=1e-6, atol=1e-6))

    # Streaming-sized, lane-dense gradient -> exercises the Pallas kernel
    # (>= 2 grid steps, "parallel" axis, SMEM coeff, output aliasing).
    xb = jax.random.normal(kx, (128, 4, 32, 32), dtype=jnp.float32)   # 2 MiB
    wb = jax.random.normal(kw, (128, 4, 32, 32), dtype=jnp.float32)
    dxb = jax.block_until_ready(
        jax.grad(lambda a: jnp.sum(gradient_reverse_layer(a, 0.3) * wb))(xb)
    )
    assert bool(jnp.allclose(dxb, -0.3 * wb, rtol=1e-5, atol=1e-5))

    # Non-lane-dense total size -> exercises the padded (unmasked-store) path.
    xc = jax.random.normal(kx, (2, 3, 300, 301), dtype=jnp.float32)   # ~2.1 MiB
    dxc = jax.block_until_ready(
        jax.grad(lambda a: jnp.sum(gradient_reverse_layer(a, 0.7)))(xc)
    )
    assert bool(jnp.allclose(dxc, -0.7 * jnp.ones_like(xc), rtol=1e-6, atol=1e-6))

    print("KERNEL_OK")
</pallas_src>

<mosaic_0001>
module attributes {stable_mosaic.version = 11 : i64} {
  func.func @_neg_scale_kernel(%arg0: i32, %arg1: memref<1xf32, #tpu.memory_space<smem>>, %arg2: memref<64x4096xf32, #tpu.memory_space<vmem>>, %arg3: memref<64x4096xf32, #tpu.memory_space<vmem>>) attributes {dimension_semantics = [#tpu.dimension_semantics<parallel>], iteration_bounds = array<i64: 2>, scalar_prefetch = 0 : i64, scratch_operands = 0 : i64, tpu.core_type = #tpu.core_type<tc>, window_params = [{transform_indices = @transform_0, window_bounds = array<i64: 1>}, {transform_indices = @transform_1, window_bounds = array<i64: 64, 4096>}, {transform_indices = @transform_2, window_bounds = array<i64: 64, 4096>}]} {
    %c0 = arith.constant 0 : index
    %0 = memref.load %arg1[%c0] : memref<1xf32, #tpu.memory_space<smem>>
    %c0_0 = arith.constant 0 : index
    %c0_1 = arith.constant 0 : index
    %1 = vector.load %arg2[%c0_0, %c0_1] : memref<64x4096xf32, #tpu.memory_space<vmem>>, vector<64x4096xf32>
    %2 = vector.broadcast %0 : f32 to vector<64x4096xf32>
    %3 = arith.mulf %1, %2 : vector<64x4096xf32>
    %c0_2 = arith.constant 0 : index
    %c0_3 = arith.constant 0 : index
    %4 = vector.load %arg3[%c0_2, %c0_3] : memref<64x4096xf32, #tpu.memory_space<vmem>>, vector<64x4096xf32>
    tpu.vector_store %arg3[%c0_2, %c0_3], %3 {strides = array<i32>} : memref<64x4096xf32, #tpu.memory_space<vmem>>, vector<64x4096xf32>,
    return
  }
  func.func @transform_0(%arg0: i32) -> i32 {
    %c0_i32 = arith.constant 0 : i32
    %c0_i32_0 = arith.constant 0 : i32
    return %c0_i32 : i32
  }
  func.func @transform_1(%arg0: i32) -> (i32, i32) {
    %c0_i32 = arith.constant 0 : i32
    %c0_i32_0 = arith.constant 0 : i32
    return %arg0, %c0_i32 : i32, i32
  }
  func.func @transform_2(%arg0: i32) -> (i32, i32) {
    %c0_i32 = arith.constant 0 : i32
    %c0_i32_0 = arith.constant 0 : i32
    return %arg0, %c0_i32 : i32, i32
  }
}

</mosaic_0001>

<bundles_post_ra>
// kernel: tpu_custom_call.1
= control target key start
LH: loop header
LB: loop body
LE: loop exit
PB: predicated region body
PF: predicated region fallthrough
CT: control target
= control target key end

     0   :  { %s2153_s0 = inlined_call_operand.<no memory space> [shape: f32[1], index: 0, kind: input, shape index: {}]   ;;  %s2154_s1 = inlined_call_operand.hbm [shape: f32[128,4096], index: 1, kind: input, shape index: {}, may-alias: {1,2}]   ;;  %s2155_s2 = inlined_call_operand.hbm [shape: f32[128,4096], index: 2, kind: output, shape index: {}, may-alias: {1,2}]  }
   0x1   :  { %7 = sst [smem:[#allocation2]] %s2153_s0 }
   0x2   :  { %8 = vsyncpa [#allocation4], 0 }
   0x3   :  { %10 = vsyncpa [#allocation4 + $0x1], 0 }
   0x4   :  { %11 = vsyncpa [#allocation5], 0 }
   0x5   :  { %13 = vsyncpa [#allocation5 + $0x1], 0  ;;  %s1216_s11 = smov 0   ;;  %s1218_s12 = smov 0  }
   0x6   :  { %s1220_s13 = smov 0   ;;  %s1222_s14 = smov 0  }
   0x7 LB: > { %s1237_s0 = sadd.s32 4294967295, %s1190_s14   ;;  %s1024_s15 = sadd.s32 4294967294, %s1190_s14   ;;  %s1190_s14 = sphi %s1222_s14, %s2168_s14   ;;  %s1186_s13 = sphi %s1220_s13, %s2167_s13   ;;  %s1182_s12 = sphi %s1218_s12, %s2166_s12   ;;  %s1178_s11 = sphi %s1216_s11, %s2165_s11  }
   0x8   : > { %s1241_s16 = sadd.s32 1, %s1190_s14   ;;  %s47_s17 = sadd.s32 1, %s1186_s13 }
   0x9   : > { %s44_s18 = ssub.s32 %s1190_s14, %s1241_s16  ;;  %p54_p0 = scmp.ne.s32.totalorder %s1186_s13, %s1182_s12 }
   0xa   : > { %p45_p1 = scmp.eq.s32.totalorder %s44_s18, 0  ;;  %p55_p2 = scmp.eq.s32.totalorder %s1190_s14, 0 }
   0xb   : > { %p60_p3 = scmp.ne.s32.totalorder %s1182_s12, %s1178_s11  ;;  %p61_p4 = scmp.eq.s32.totalorder %s1237_s0, 0 }
   0xc   : > { %s1253_s19 = scalar_select %p45_p1, %s1186_s13, %s47_s17  }
   0xd   : > { %p1255_p5 = por %p55_p2, %p54_p0  ;;  %p1259_p6 = por %p61_p4, %p60_p3 }
   0xe   : > { %p84_p7 = scmp.eq.s32.totalorder %s1237_s0, 1  ;;  %p90_p8 = scmp.eq.s32.totalorder %s1024_s15, 1 }
   0xf   : > { %p1056_p10 = scmp.lt.s32.totalorder %s1190_s14, 2  ;;  %s113_s24 = sand.u32 1, %s1186_s13  }
  0x10   : > { %p1266_p11 = por %p84_p7, %p54_p0  ;;  %p1270_p12 = por %p90_p8, %p60_p3 }
  0x11   : > { %s1041_s25 = sshll.u32 %s1190_s14, 15  ;;  %s1027_s26 = sshll.u32 %s113_s24, 11 }
  0x12   : > { %s2159_s22 = scalar_select %p1266_p11, 1, 0 }
  0x13   : > { %s2160_s23 = scalar_select %p1270_p12, 1, 0 }
  0x14   : > { %s1279_s29 = scalar_lea.hbm %s2154_s1, %s1041_s25  ;;  %s117_s30 = scalar_lea.vmem [#allocation3], %s1027_s26 }
  0x15   : > { %s125_s3 = sshll.u32 %s117_s30, 4  ;;  %p1283_p13 = pnand %p1056_p10, %p1255_p5  ;;  %s1287_s3 = int_to_ptr.vmem [resolvable:$true] %s125_s3 }
  0x16   : > { %s1289_s5 = scalar_lea.sflag [#allocation4], %s113_s24  ;;  %s1094_s6 = scalar_lea.hbm %s1279_s29, 32768 }
  0x17   : > { %p1095_p0 = scmp.ne.s32.totalorder %s1279_s29, %s1094_s6  ;;  %p1096_p1 = pneg %p1283_p13 }
  0x18   : > { %s1099_s9 = scalar_lea.hbm %s2154_s1, 65536  ;;  %p1100_p4 = scmp.lt.u32.totalorder %s1279_s29, %s2154_s1 }
  0x19   : > { %p1097_p2 = pnand %p1096_p1, %p1095_p0  ;;  %p1101_p5 = scmp.lt.u32.totalorder %s1099_s9, %s1094_s6 }
  0x1a   : > { %p1103_p8 = scmp.lt.u32.totalorder %s1094_s6, %s1279_s29 }
  0x1b   : > { %p1098_p3 = pneg %p1097_p2  ;;  %p1102_p7 = por %p1101_p5, %p1100_p4 }
  0x1d   : > { %p1104_p10 = por %p1103_p8, %p1102_p7 }
  0x1f   : > { %p1105_p9 = pnand %p1104_p10, %p1098_p3 }
  0x21   : > { %1108 = shalt.err (!%p1105_p9)
}
  0x22   : > { %s1109_s17 = scalar_lea.vmem %s1287_s3, 32768  ;;  %s1192_s18 = smov [#allocation3]  }
  0x23   : > { %p1110_p0 = scmp.ne.s32.totalorder %s1287_s3, %s1109_s17  ;;  %s1114_s20 = sshll.u32 %s1192_s18, 4  ;;  %s1115_s20 = int_to_ptr.vmem [resolvable:$false] %s1114_s20 }
  0x24   : > { %s1116_s24 = scalar_lea.vmem %s1115_s20, 65536  ;;  %p1117_p11 = scmp.lt.s32.totalorder %s1287_s3, %s1115_s20 }
  0x25   : > { %p1112_p2 = pnand %p1110_p0, %p1096_p1  ;;  %p1118_p4 = scmp.lt.s32.totalorder %s1116_s24, %s1109_s17 }
  0x27   : > { %p1113_p12 = pneg %p1112_p2  ;;  %p1119_p5 = por %p1118_p4, %p1117_p11 }
  0x29   : > { %p1120_p7 = pnand %p1119_p5, %p1113_p12 }
  0x2b   : > { %1123 = shalt.err (!%p1120_p7)
}
  0x2c   : > { %s1193_s25 = smov 4096   ;;  %s1194_s26 = smov 256  }
  0x2d   : > { %1051 = dma.hbm_to_vmem [thread:$0]  (!%p1283_p13), %s1279_s29, 32768, %s1287_s3, %s1289_s5, %s1193_s25, %s1193_s25, %s1194_s26  }
  0x2e   : > { %p1031_p9 = scmp.ge.s32.totalorder %s1190_s14, 1  ;;  %p133_p1 = scmp.lt.s32.totalorder %s1190_s14, 3 }
  0x30   : > { %p134_p3 = pnand %p1031_p9, %p133_p1 }
  0x31   : > { %s1320_s27 = sand.u32 (!%p134_p3), 1, %s1182_s12  }
  0x32   : > { %137 = sbr.rel (%p134_p3) target bundleno = 209 (0xd1), region = 28  ;;  %s1032_s28 = sshll.u32 (!%p134_p3), %s1320_s27, 11 }
  0x33   : > { %s140_s30 = scalar_lea.sflag (!%p134_p3), [#allocation4], %s1320_s27  ;;  %s1324_s6 = scalar_lea.vmem (!%p134_p3), [#allocation3], %s1032_s28 }
  0x39   : > { %1169 = dma.done.wait (%p1259_p6), %s140_s30, 32768  }
  0x3a   : > { %1171 = vsyncadd (%p1259_p6), %s140_s30, 4294934528  ;;  %s166_s29 = sld [smem:[#allocation2]]  ;;  %v167_v0 = vld [vmem:[%s1324_s6] sm:$0xff]  ;;  %v168_v2 = vld [vmem:[%s1324_s6 + $0x8] sm:$0xff]  ;;  %s1347_s21 = scalar_lea.vmem [#allocation6], %s1032_s28 }
  0x3b   : > { %v169_v3 = vld [vmem:[%s1324_s6 + $0x10] sm:$0xff]  ;;  %v170_v7 = vld [vmem:[%s1324_s6 + $0x18] sm:$0xff]  ;;  %v171_v8 = vld [vmem:[%s1324_s6 + $0x20] sm:$0xff]  ;;  %s1043_s3 = sshll.u32 %s1237_s0, 15  ;;  %s951_s4 = sshll.u32 %s1347_s21, 4  ;;  %s2101_s4 = int_to_ptr.vmem [resolvable:$true] %s951_s4 }
  0x3c   : > { %v172_v9 = vld [vmem:[%s1324_s6 + $0x28] sm:$0xff]  ;;  %v173_v13 = vld [vmem:[%s1324_s6 + $0x30] sm:$0xff]  ;;  %v174_v14 = vld [vmem:[%s1324_s6 + $0x38] sm:$0xff]  ;;  %s2099_s7 = scalar_lea.hbm %s2155_s2, %s1043_s3  ;;  %s937_s8 = scalar_lea.sflag [#allocation5], %s1320_s27 }
  0x3d   : > { %v175_v15 = vld [vmem:[%s1324_s6 + $0x40] sm:$0xff]  ;;  %v176_v19 = vld [vmem:[%s1324_s6 + $0x48] sm:$0xff]  ;;  %v177_v20 = vld [vmem:[%s1324_s6 + $0x50] sm:$0xff]  ;;  %s1124_s9 = scalar_lea.vmem %s2101_s4, 32768  ;;  %p2162_p11 = scmp.ne.s32.totalorder %s2159_s22, 0 }
  0x3e   : > { %v178_v21 = vld [vmem:[%s1324_s6 + $0x58] sm:$0xff]  ;;  %v179_v25 = vld [vmem:[%s1324_s6 + $0x60] sm:$0xff]  ;;  %v180_v26 = vld [vmem:[%s1324_s6 + $0x68] sm:$0xff]  ;;  %p1125_p6 = scmp.ne.s32.totalorder %s2101_s4, %s1124_s9  ;;  %s1195_s10 = smov [#allocation6]  }
  0x3f   : > { %v181_v27 = vld [vmem:[%s1324_s6 + $0x70] sm:$0xff]  ;;  %v182_v31 = vld [vmem:[%s1324_s6 + $0x78] sm:$0xff]  ;;  %v183_v32 = vld [vmem:[%s1324_s6 + $0x80] sm:$0xff]  ;;  %s1128_s15 = sshll.u32 %s1195_s10, 4  ;;  %s1129_s15 = int_to_ptr.vmem [resolvable:$false] %s1128_s15 }
  0x40   : > { %v1331_v1 = vstv %s166_s29  ;;  %v184_v33 = vld [vmem:[%s1324_s6 + $0x88] sm:$0xff]  ;;  %v185_v37 = vld [vmem:[%s1324_s6 + $0x90] sm:$0xff]  ;;  %v186_v38 = vld [vmem:[%s1324_s6 + $0x98] sm:$0xff]  ;;  %p1126_p12 = pnand %p1125_p6, %p2162_p11  ;;  %s1130_s17 = scalar_lea.vmem %s1129_s15, 65536 }
  0x41   : > { %v424_v4 = vmul.f32 %v1331_v1, %v167_v0  ;;  %v425_v5 = vmul.f32 %v1331_v1, %v168_v2  ;;  %v426_v6 = vmul.f32 %v1331_v1, %v169_v3  ;;  %v427_v10 = vmul.f32 %v1331_v1, %v170_v7  ;;  %v187_v39 = vld [vmem:[%s1324_s6 + $0xa0] sm:$0xff]  ;;  %v188_v43 = vld [vmem:[%s1324_s6 + $0xa8] sm:$0xff]  ;;  %v189_v44 = vld [vmem:[%s1324_s6 + $0xb0] sm:$0xff]  ;;  %p1131_p8 = scmp.lt.s32.totalorder %s2101_s4, %s1129_s15  ;;  %p1132_p10 = scmp.lt.s32.totalorder %s1130_s17, %s1124_s9 }
  0x42   : > { %v428_v11 = vmul.f32 %v1331_v1, %v171_v8  ;;  %v429_v12 = vmul.f32 %v1331_v1, %v172_v9  ;;  %v430_v16 = vmul.f32 %v1331_v1, %v173_v13  ;;  %v431_v17 = vmul.f32 %v1331_v1, %v174_v14  ;;  %v190_v45 = vld [vmem:[%s1324_s6 + $0xb8] sm:$0xff]  ;;  %v191_v49 = vld [vmem:[%s1324_s6 + $0xc0] sm:$0xff]  ;;  %v192_v50 = vld [vmem:[%s1324_s6 + $0xc8] sm:$0xff]  ;;  %p1127_p13 = pneg %p1126_p12 }
  0x43   : > { %680 = vst [vmem:[%s1347_s21] sm:$0xff] %v424_v4  ;;  %681 = vst [vmem:[%s1347_s21 + $0x8] sm:$0xff] %v425_v5  ;;  %v432_v18 = vmul.f32 %v1331_v1, %v175_v15  ;;  %v433_v22 = vmul.f32 %v1331_v1, %v176_v19  ;;  %v434_v23 = vmul.f32 %v1331_v1, %v177_v20  ;;  %v193_v51 = vld [vmem:[%s1324_s6 + $0xd0] sm:$0xff]  ;;  %v194_v55 = vld [vmem:[%s1324_s6 + $0xd8] sm:$0xff]  ;;  %p1133_p0 = por %p1132_p10, %p1131_p8 }
  0x44   : > { %682 = vst [vmem:[%s1347_s21 + $0x10] sm:$0xff] %v426_v6  ;;  %683 = vst [vmem:[%s1347_s21 + $0x18] sm:$0xff] %v427_v10  ;;  %v435_v24 = vmul.f32 %v1331_v1, %v178_v21  ;;  %v436_v28 = vmul.f32 %v1331_v1, %v179_v25  ;;  %v437_v29 = vmul.f32 %v1331_v1, %v180_v26  ;;  %v195_v56 = vld [vmem:[%s1324_s6 + $0xe0] sm:$0xff]  ;;  %v196_v57 = vld [vmem:[%s1324_s6 + $0xe8] sm:$0xff] }
  0x45   : > { %684 = vst [vmem:[%s1347_s21 + $0x20] sm:$0xff] %v428_v11  ;;  %685 = vst [vmem:[%s1347_s21 + $0x28] sm:$0xff] %v429_v12  ;;  %v438_v30 = vmul.f32 %v1331_v1, %v181_v27  ;;  %v439_v34 = vmul.f32 %v1331_v1, %v182_v31  ;;  %v440_v35 = vmul.f32 %v1331_v1, %v183_v32  ;;  %v197_v61 = vld [vmem:[%s1324_s6 + $0xf0] sm:$0xff]  ;;  %v198_v62 = vld [vmem:[%s1324_s6 + $0xf8] sm:$0xff]  ;;  %p1134_p2 = pnand %p1133_p0, %p1127_p13 }
  0x46   : > { %686 = vst [vmem:[%s1347_s21 + $0x30] sm:$0xff] %v430_v16  ;;  %687 = vst [vmem:[%s1347_s21 + $0x38] sm:$0xff] %v431_v17  ;;  %v441_v36 = vmul.f32 %v1331_v1, %v184_v33  ;;  %v442_v40 = vmul.f32 %v1331_v1, %v185_v37  ;;  %v443_v41 = vmul.f32 %v1331_v1, %v186_v38  ;;  %v199_v63 = vld [vmem:[%s1324_s6 + $0x100] sm:$0xff]  ;;  %v200_v4 = vld [vmem:[%s1324_s6 + $0x108] sm:$0xff] }
  0x47   : > { %688 = vst [vmem:[%s1347_s21 + $0x40] sm:$0xff] %v432_v18  ;;  %689 = vst [vmem:[%s1347_s21 + $0x48] sm:$0xff] %v433_v22  ;;  %v444_v42 = vmul.f32 %v1331_v1, %v187_v39  ;;  %v445_v46 = vmul.f32 %v1331_v1, %v188_v43  ;;  %v446_v47 = vmul.f32 %v1331_v1, %v189_v44  ;;  %v201_v5 = vld [vmem:[%s1324_s6 + $0x110] sm:$0xff]  ;;  %v202_v6 = vld [vmem:[%s1324_s6 + $0x118] sm:$0xff] }
  0x48   : > { %690 = vst [vmem:[%s1347_s21 + $0x50] sm:$0xff] %v434_v23  ;;  %691 = vst [vmem:[%s1347_s21 + $0x58] sm:$0xff] %v435_v24  ;;  %v447_v48 = vmul.f32 %v1331_v1, %v190_v45  ;;  %v448_v52 = vmul.f32 %v1331_v1, %v191_v49  ;;  %v449_v53 = vmul.f32 %v1331_v1, %v192_v50  ;;  %v203_v10 = vld [vmem:[%s1324_s6 + $0x120] sm:$0xff]  ;;  %v204_v11 = vld [vmem:[%s1324_s6 + $0x128] sm:$0xff] }
  0x49   : > { %692 = vst [vmem:[%s1347_s21 + $0x60] sm:$0xff] %v436_v28  ;;  %693 = vst [vmem:[%s1347_s21 + $0x68] sm:$0xff] %v437_v29  ;;  %v450_v54 = vmul.f32 %v1331_v1, %v193_v51  ;;  %v451_v58 = vmul.f32 %v1331_v1, %v194_v55  ;;  %v452_v59 = vmul.f32 %v1331_v1, %v195_v56  ;;  %v205_v12 = vld [vmem:[%s1324_s6 + $0x130] sm:$0xff]  ;;  %v206_v16 = vld [vmem:[%s1324_s6 + $0x138] sm:$0xff] }
  0x4a   : > { %694 = vst [vmem:[%s1347_s21 + $0x70] sm:$0xff] %v438_v30  ;;  %695 = vst [vmem:[%s1347_s21 + $0x78] sm:$0xff] %v439_v34  ;;  %v453_v60 = vmul.f32 %v1331_v1, %v196_v57  ;;  %v454_v0 = vmul.f32 %v1331_v1, %v197_v61  ;;  %v455_v2 = vmul.f32 %v1331_v1, %v198_v62  ;;  %v207_v17 = vld [vmem:[%s1324_s6 + $0x140] sm:$0xff]  ;;  %v208_v18 = vld [vmem:[%s1324_s6 + $0x148] sm:$0xff] }
  0x4b   : > { %696 = vst [vmem:[%s1347_s21 + $0x80] sm:$0xff] %v440_v35  ;;  %697 = vst [vmem:[%s1347_s21 + $0x88] sm:$0xff] %v441_v36  ;;  %v456_v3 = vmul.f32 %v1331_v1, %v199_v63  ;;  %v457_v7 = vmul.f32 %v1331_v1, %v200_v4  ;;  %v458_v8 = vmul.f32 %v1331_v1, %v201_v5  ;;  %v209_v22 = vld [vmem:[%s1324_s6 + $0x150] sm:$0xff]  ;;  %v210_v23 = vld [vmem:[%s1324_s6 + $0x158] sm:$0xff] }
  0x4c   : > { %698 = vst [vmem:[%s1347_s21 + $0x90] sm:$0xff] %v442_v40  ;;  %699 = vst [vmem:[%s1347_s21 + $0x98] sm:$0xff] %v443_v41  ;;  %v459_v9 = vmul.f32 %v1331_v1, %v202_v6  ;;  %v460_v13 = vmul.f32 %v1331_v1, %v203_v10  ;;  %v461_v14 = vmul.f32 %v1331_v1, %v204_v11  ;;  %v211_v24 = vld [vmem:[%s1324_s6 + $0x160] sm:$0xff]  ;;  %v212_v28 = vld [vmem:[%s1324_s6 + $0x168] sm:$0xff] }
  0x4d   : > { %700 = vst [vmem:[%s1347_s21 + $0xa0] sm:$0xff] %v444_v42  ;;  %701 = vst [vmem:[%s1347_s21 + $0xa8] sm:$0xff] %v445_v46  ;;  %v462_v15 = vmul.f32 %v1331_v1, %v205_v12  ;;  %v463_v19 = vmul.f32 %v1331_v1, %v206_v16  ;;  %v464_v20 = vmul.f32 %v1331_v1, %v207_v17  ;;  %v213_v29 = vld [vmem:[%s1324_s6 + $0x170] sm:$0xff]  ;;  %v214_v30 = vld [vmem:[%s1324_s6 + $0x178] sm:$0xff] }
  0x4e   : > { %702 = vst [vmem:[%s1347_s21 + $0xb0] sm:$0xff] %v446_v47  ;;  %703 = vst [vmem:[%s1347_s21 + $0xb8] sm:$0xff] %v447_v48  ;;  %v465_v21 = vmul.f32 %v1331_v1, %v208_v18  ;;  %v466_v25 = vmul.f32 %v1331_v1, %v209_v22  ;;  %v467_v26 = vmul.f32 %v1331_v1, %v210_v23  ;;  %v215_v34 = vld [vmem:[%s1324_s6 + $0x180] sm:$0xff]  ;;  %v216_v35 = vld [vmem:[%s1324_s6 + $0x188] sm:$0xff] }
  0x4f   : > { %704 = vst [vmem:[%s1347_s21 + $0xc0] sm:$0xff] %v448_v52  ;;  %705 = vst [vmem:[%s1347_s21 + $0xc8] sm:$0xff] %v449_v53  ;;  %v468_v27 = vmul.f32 %v1331_v1, %v211_v24  ;;  %v469_v31 = vmul.f32 %v1331_v1, %v212_v28  ;;  %v470_v32 = vmul.f32 %v1331_v1, %v213_v29  ;;  %v217_v36 = vld [vmem:[%s1324_s6 + $0x190] sm:$0xff]  ;;  %v218_v40 = vld [vmem:[%s1324_s6 + $0x198] sm:$0xff] }
  0x50   : > { %706 = vst [vmem:[%s1347_s21 + $0xd0] sm:$0xff] %v450_v54  ;;  %707 = vst [vmem:[%s1347_s21 + $0xd8] sm:$0xff] %v451_v58  ;;  %v471_v33 = vmul.f32 %v1331_v1, %v214_v30  ;;  %v472_v37 = vmul.f32 %v1331_v1, %v215_v34  ;;  %v473_v38 = vmul.f32 %v1331_v1, %v216_v35  ;;  %v219_v41 = vld [vmem:[%s1324_s6 + $0x1a0] sm:$0xff]  ;;  %v220_v42 = vld [vmem:[%s1324_s6 + $0x1a8] sm:$0xff] }
  0x51   : > { %708 = vst [vmem:[%s1347_s21 + $0xe0] sm:$0xff] %v452_v59  ;;  %709 = vst [vmem:[%s1347_s21 + $0xe8] sm:$0xff] %v453_v60  ;;  %v474_v39 = vmul.f32 %v1331_v1, %v217_v36  ;;  %v475_v43 = vmul.f32 %v1331_v1, %v218_v40  ;;  %v476_v44 = vmul.f32 %v1331_v1, %v219_v41  ;;  %v221_v46 = vld [vmem:[%s1324_s6 + $0x1b0] sm:$0xff]  ;;  %v222_v47 = vld [vmem:[%s1324_s6 + $0x1b8] sm:$0xff] }
  0x52   : > { %710 = vst [vmem:[%s1347_s21 + $0xf0] sm:$0xff] %v454_v0  ;;  %711 = vst [vmem:[%s1347_s21 + $0xf8] sm:$0xff] %v455_v2  ;;  %v477_v45 = vmul.f32 %v1331_v1, %v220_v42  ;;  %v223_v48 = vld [vmem:[%s1324_s6 + $0x1c0] sm:$0xff]  ;;  %v478_v49 = vmul.f32 %v1331_v1, %v221_v46  ;;  %v479_v50 = vmul.f32 %v1331_v1, %v222_v47  ;;  %v224_v52 = vld [vmem:[%s1324_s6 + $0x1c8] sm:$0xff] }
  0x53   : > { %712 = vst [vmem:[%s1347_s21 + $0x100] sm:$0xff] %v456_v3  ;;  %713 = vst [vmem:[%s1347_s21 + $0x108] sm:$0xff] %v457_v7  ;;  %v480_v51 = vmul.f32 %v1331_v1, %v223_v48  ;;  %v225_v53 = vld [vmem:[%s1324_s6 + $0x1d0] sm:$0xff]  ;;  %v226_v54 = vld [vmem:[%s1324_s6 + $0x1d8] sm:$0xff]  ;;  %v481_v55 = vmul.f32 %v1331_v1, %v224_v52 }
  0x54   : > { %714 = vst [vmem:[%s1347_s21 + $0x110] sm:$0xff] %v458_v8  ;;  %715 = vst [vmem:[%s1347_s21 + $0x118] sm:$0xff] %v459_v9  ;;  %v482_v56 = vmul.f32 %v1331_v1, %v225_v53  ;;  %v483_v57 = vmul.f32 %v1331_v1, %v226_v54  ;;  %v227_v58 = vld [vmem:[%s1324_s6 + $0x1e0] sm:$0xff]  ;;  %v228_v59 = vld [vmem:[%s1324_s6 + $0x1e8] sm:$0xff] }
  0x55   : > { %716 = vst [vmem:[%s1347_s21 + $0x120] sm:$0xff] %v460_v13  ;;  %717 = vst [vmem:[%s1347_s21 + $0x128] sm:$0xff] %v461_v14  ;;  %v229_v60 = vld [vmem:[%s1324_s6 + $0x1f0] sm:$0xff]  ;;  %v484_v61 = vmul.f32 %v1331_v1, %v227_v58  ;;  %v485_v62 = vmul.f32 %v1331_v1, %v228_v59  ;;  %v230_v0 = vld [vmem:[%s1324_s6 + $0x1f8] sm:$0xff] }
  0x56   : > { %718 = vst [vmem:[%s1347_s21 + $0x130] sm:$0xff] %v462_v15  ;;  %719 = vst [vmem:[%s1347_s21 + $0x138] sm:$0xff] %v463_v19  ;;  %v486_v63 = vmul.f32 %v1331_v1, %v229_v60  ;;  %v231_v2 = vld [vmem:[%s1324_s6 + $0x200] sm:$0xff]  ;;  %v232_v3 = vld [vmem:[%s1324_s6 + $0x208] sm:$0xff]  ;;  %v487_v4 = vmul.f32 %v1331_v1, %v230_v0 }
  0x57   : > { %720 = vst [vmem:[%s1347_s21 + $0x140] sm:$0xff] %v464_v20  ;;  %721 = vst [vmem:[%s1347_s21 + $0x148] sm:$0xff] %v465_v21  ;;  %v488_v5 = vmul.f32 %v1331_v1, %v231_v2  ;;  %v489_v6 = vmul.f32 %v1331_v1, %v232_v3  ;;  %v233_v7 = vld [vmem:[%s1324_s6 + $0x210] sm:$0xff]  ;;  %v234_v8 = vld [vmem:[%s1324_s6 + $0x218] sm:$0xff] }
  0x58   : > { %722 = vst [vmem:[%s1347_s21 + $0x150] sm:$0xff] %v466_v25  ;;  %723 = vst [vmem:[%s1347_s21 + $0x158] sm:$0xff] %v467_v26  ;;  %v235_v9 = vld [vmem:[%s1324_s6 + $0x220] sm:$0xff]  ;;  %v490_v10 = vmul.f32 %v1331_v1, %v233_v7  ;;  %v491_v11 = vmul.f32 %v1331_v1, %v234_v8  ;;  %v236_v13 = vld [vmem:[%s1324_s6 + $0x228] sm:$0xff] }
  0x59   : > { %724 = vst [vmem:[%s1347_s21 + $0x160] sm:$0xff] %v468_v27  ;;  %725 = vst [vmem:[%s1347_s21 + $0x168] sm:$0xff] %v469_v31  ;;  %v492_v12 = vmul.f32 %v1331_v1, %v235_v9  ;;  %v237_v14 = vld [vmem:[%s1324_s6 + $0x230] sm:$0xff]  ;;  %v238_v15 = vld [vmem:[%s1324_s6 + $0x238] sm:$0xff]  ;;  %v493_v16 = vmul.f32 %v1331_v1, %v236_v13 }
  0x5a   : > { %726 = vst [vmem:[%s1347_s21 + $0x170] sm:$0xff] %v470_v32  ;;  %727 = vst [vmem:[%s1347_s21 + $0x178] sm:$0xff] %v471_v33  ;;  %v494_v17 = vmul.f32 %v1331_v1, %v237_v14  ;;  %v495_v18 = vmul.f32 %v1331_v1, %v238_v15  ;;  %v239_v19 = vld [vmem:[%s1324_s6 + $0x240] sm:$0xff]  ;;  %v240_v20 = vld [vmem:[%s1324_s6 + $0x248] sm:$0xff] }
  0x5b   : > { %728 = vst [vmem:[%s1347_s21 + $0x180] sm:$0xff] %v472_v37  ;;  %729 = vst [vmem:[%s1347_s21 + $0x188] sm:$0xff] %v473_v38  ;;  %v241_v21 = vld [vmem:[%s1324_s6 + $0x250] sm:$0xff]  ;;  %v496_v22 = vmul.f32 %v1331_v1, %v239_v19  ;;  %v497_v23 = vmul.f32 %v1331_v1, %v240_v20  ;;  %v242_v25 = vld [vmem:[%s1324_s6 + $0x258] sm:$0xff] }
  0x5c   : > { %730 = vst [vmem:[%s1347_s21 + $0x190] sm:$0xff] %v474_v39  ;;  %731 = vst [vmem:[%s1347_s21 + $0x198] sm:$0xff] %v475_v43  ;;  %v498_v24 = vmul.f32 %v1331_v1, %v241_v21  ;;  %v243_v26 = vld [vmem:[%s1324_s6 + $0x260] sm:$0xff]  ;;  %v244_v27 = vld [vmem:[%s1324_s6 + $0x268] sm:$0xff]  ;;  %v499_v28 = vmul.f32 %v1331_v1, %v242_v25 }
  0x5d   : > { %732 = vst [vmem:[%s1347_s21 + $0x1a0] sm:$0xff] %v476_v44  ;;  %733 = vst [vmem:[%s1347_s21 + $0x1a8] sm:$0xff] %v477_v45  ;;  %v500_v29 = vmul.f32 %v1331_v1, %v243_v26  ;;  %v501_v30 = vmul.f32 %v1331_v1, %v244_v27  ;;  %v245_v31 = vld [vmem:[%s1324_s6 + $0x270] sm:$0xff]  ;;  %v246_v32 = vld [vmem:[%s1324_s6 + $0x278] sm:$0xff] }
  0x5e   : > { %734 = vst [vmem:[%s1347_s21 + $0x1b0] sm:$0xff] %v478_v49  ;;  %735 = vst [vmem:[%s1347_s21 + $0x1b8] sm:$0xff] %v479_v50  ;;  %v247_v33 = vld [vmem:[%s1324_s6 + $0x280] sm:$0xff]  ;;  %v502_v34 = vmul.f32 %v1331_v1, %v245_v31  ;;  %v503_v35 = vmul.f32 %v1331_v1, %v246_v32  ;;  %v248_v37 = vld [vmem:[%s1324_s6 + $0x288] sm:$0xff] }
  0x5f   : > { %736 = vst [vmem:[%s1347_s21 + $0x1c0] sm:$0xff] %v480_v51  ;;  %737 = vst [vmem:[%s1347_s21 + $0x1c8] sm:$0xff] %v481_v55  ;;  %v504_v36 = vmul.f32 %v1331_v1, %v247_v33  ;;  %v249_v38 = vld [vmem:[%s1324_s6 + $0x290] sm:$0xff]  ;;  %v250_v39 = vld [vmem:[%s1324_s6 + $0x298] sm:$0xff]  ;;  %v505_v40 = vmul.f32 %v1331_v1, %v248_v37 }
  0x60   : > { %738 = vst [vmem:[%s1347_s21 + $0x1d0] sm:$0xff] %v482_v56  ;;  %739 = vst [vmem:[%s1347_s21 + $0x1d8] sm:$0xff] %v483_v57  ;;  %v506_v41 = vmul.f32 %v1331_v1, %v249_v38  ;;  %v507_v42 = vmul.f32 %v1331_v1, %v250_v39  ;;  %v251_v43 = vld [vmem:[%s1324_s6 + $0x2a0] sm:$0xff]  ;;  %v252_v44 = vld [vmem:[%s1324_s6 + $0x2a8] sm:$0xff] }
  0x61   : > { %740 = vst [vmem:[%s1347_s21 + $0x1e0] sm:$0xff] %v484_v61  ;;  %741 = vst [vmem:[%s1347_s21 + $0x1e8] sm:$0xff] %v485_v62  ;;  %v253_v45 = vld [vmem:[%s1324_s6 + $0x2b0] sm:$0xff]  ;;  %v508_v46 = vmul.f32 %v1331_v1, %v251_v43  ;;  %v509_v47 = vmul.f32 %v1331_v1, %v252_v44  ;;  %v254_v49 = vld [vmem:[%s1324_s6 + $0x2b8] sm:$0xff] }
  0x62   : > { %742 = vst [vmem:[%s1347_s21 + $0x1f0] sm:$0xff] %v486_v63  ;;  %743 = vst [vmem:[%s1347_s21 + $0x1f8] sm:$0xff] %v487_v4  ;;  %v510_v48 = vmul.f32 %v1331_v1, %v253_v45  ;;  %v255_v50 = vld [vmem:[%s1324_s6 + $0x2c0] sm:$0xff]  ;;  %v256_v51 = vld [vmem:[%s1324_s6 + $0x2c8] sm:$0xff]  ;;  %v511_v52 = vmul.f32 %v1331_v1, %v254_v49 }
  0x63   : > { %744 = vst [vmem:[%s1347_s21 + $0x200] sm:$0xff] %v488_v5  ;;  %745 = vst [vmem:[%s1347_s21 + $0x208] sm:$0xff] %v489_v6  ;;  %v512_v53 = vmul.f32 %v1331_v1, %v255_v50  ;;  %v513_v54 = vmul.f32 %v1331_v1, %v256_v51  ;;  %v257_v55 = vld [vmem:[%s1324_s6 + $0x2d0] sm:$0xff]  ;;  %v258_v56 = vld [vmem:[%s1324_s6 + $0x2d8] sm:$0xff] }
  0x64   : > { %746 = vst [vmem:[%s1347_s21 + $0x210] sm:$0xff] %v490_v10  ;;  %747 = vst [vmem:[%s1347_s21 + $0x218] sm:$0xff] %v491_v11  ;;  %v259_v57 = vld [vmem:[%s1324_s6 + $0x2e0] sm:$0xff]  ;;  %v514_v58 = vmul.f32 %v1331_v1, %v257_v55  ;;  %v515_v59 = vmul.f32 %v1331_v1, %v258_v56  ;;  %v260_v61 = vld [vmem:[%s1324_s6 + $0x2e8] sm:$0xff] }
  0x65   : > { %748 = vst [vmem:[%s1347_s21 + $0x220] sm:$0xff] %v492_v12  ;;  %749 = vst [vmem:[%s1347_s21 + $0x228] sm:$0xff] %v493_v16  ;;  %v516_v60 = vmul.f32 %v1331_v1, %v259_v57  ;;  %v261_v62 = vld [vmem:[%s1324_s6 + $0x2f0] sm:$0xff]  ;;  %v262_v63 = vld [vmem:[%s1324_s6 + $0x2f8] sm:$0xff]  ;;  %v517_v0 = vmul.f32 %v1331_v1, %v260_v61 }
  0x66   : > { %750 = vst [vmem:[%s1347_s21 + $0x230] sm:$0xff] %v494_v17  ;;  %751 = vst [vmem:[%s1347_s21 + $0x238] sm:$0xff] %v495_v18  ;;  %v518_v2 = vmul.f32 %v1331_v1, %v261_v62  ;;  %v519_v3 = vmul.f32 %v1331_v1, %v262_v63  ;;  %v263_v4 = vld [vmem:[%s1324_s6 + $0x300] sm:$0xff]  ;;  %v264_v5 = vld [vmem:[%s1324_s6 + $0x308] sm:$0xff] }
  0x67   : > { %752 = vst [vmem:[%s1347_s21 + $0x240] sm:$0xff] %v496_v22  ;;  %753 = vst [vmem:[%s1347_s21 + $0x248] sm:$0xff] %v497_v23  ;;  %v265_v6 = vld [vmem:[%s1324_s6 + $0x310] sm:$0xff]  ;;  %v520_v7 = vmul.f32 %v1331_v1, %v263_v4  ;;  %v521_v8 = vmul.f32 %v1331_v1, %v264_v5  ;;  %v266_v10 = vld [vmem:[%s1324_s6 + $0x318] sm:$0xff] }
  0x68   : > { %754 = vst [vmem:[%s1347_s21 + $0x250] sm:$0xff] %v498_v24  ;;  %755 = vst [vmem:[%s1347_s21 + $0x258] sm:$0xff] %v499_v28  ;;  %v522_v9 = vmul.f32 %v1331_v1, %v265_v6  ;;  %v267_v11 = vld [vmem:[%s1324_s6 + $0x320] sm:$0xff]  ;;  %v268_v12 = vld [vmem:[%s1324_s6 + $0x328] sm:$0xff]  ;;  %v523_v13 = vmul.f32 %v1331_v1, %v266_v10 }
  0x69   : > { %756 = vst [vmem:[%s1347_s21 + $0x260] sm:$0xff] %v500_v29  ;;  %757 = vst [vmem:[%s1347_s21 + $0x268] sm:$0xff] %v501_v30  ;;  %v524_v14 = vmul.f32 %v1331_v1, %v267_v11  ;;  %v525_v15 = vmul.f32 %v1331_v1, %v268_v12  ;;  %v269_v16 = vld [vmem:[%s1324_s6 + $0x330] sm:$0xff]  ;;  %v270_v17 = vld [vmem:[%s1324_s6 + $0x338] sm:$0xff] }
  0x6a   : > { %758 = vst [vmem:[%s1347_s21 + $0x270] sm:$0xff] %v502_v34  ;;  %759 = vst [vmem:[%s1347_s21 + $0x278] sm:$0xff] %v503_v35  ;;  %v271_v18 = vld [vmem:[%s1324_s6 + $0x340] sm:$0xff]  ;;  %v526_v19 = vmul.f32 %v1331_v1, %v269_v16  ;;  %v527_v20 = vmul.f32 %v1331_v1, %v270_v17  ;;  %v272_v22 = vld [vmem:[%s1324_s6 + $0x348] sm:$0xff] }
  0x6b   : > { %760 = vst [vmem:[%s1347_s21 + $0x280] sm:$0xff] %v504_v36  ;;  %761 = vst [vmem:[%s1347_s21 + $0x288] sm:$0xff] %v505_v40  ;;  %v528_v21 = vmul.f32 %v1331_v1, %v271_v18  ;;  %v273_v23 = vld [vmem:[%s1324_s6 + $0x350] sm:$0xff]  ;;  %v274_v24 = vld [vmem:[%s1324_s6 + $0x358] sm:$0xff]  ;;  %v529_v25 = vmul.f32 %v1331_v1, %v272_v22 }
  0x6c   : > { %762 = vst [vmem:[%s1347_s21 + $0x290] sm:$0xff] %v506_v41  ;;  %763 = vst [vmem:[%s1347_s21 + $0x298] sm:$0xff] %v507_v42  ;;  %v530_v26 = vmul.f32 %v1331_v1, %v273_v23  ;;  %v531_v27 = vmul.f32 %v1331_v1, %v274_v24  ;;  %v275_v28 = vld [vmem:[%s1324_s6 + $0x360] sm:$0xff]  ;;  %v276_v29 = vld [vmem:[%s1324_s6 + $0x368] sm:$0xff] }
  0x6d   : > { %764 = vst [vmem:[%s1347_s21 + $0x2a0] sm:$0xff] %v508_v46  ;;  %765 = vst [vmem:[%s1347_s21 + $0x2a8] sm:$0xff] %v509_v47  ;;  %v277_v30 = vld [vmem:[%s1324_s6 + $0x370] sm:$0xff]  ;;  %v532_v31 = vmul.f32 %v1331_v1, %v275_v28  ;;  %v533_v32 = vmul.f32 %v1331_v1, %v276_v29  ;;  %v278_v34 = vld [vmem:[%s1324_s6 + $0x378] sm:$0xff] }
  0x6e   : > { %766 = vst [vmem:[%s1347_s21 + $0x2b0] sm:$0xff] %v510_v48  ;;  %767 = vst [vmem:[%s1347_s21 + $0x2b8] sm:$0xff] %v511_v52  ;;  %v534_v33 = vmul.f32 %v1331_v1, %v277_v30  ;;  %v279_v35 = vld [vmem:[%s1324_s6 + $0x380] sm:$0xff]  ;;  %v280_v36 = vld [vmem:[%s1324_s6 + $0x388] sm:$0xff]  ;;  %v535_v37 = vmul.f32 %v1331_v1, %v278_v34 }
  0x6f   : > { %768 = vst [vmem:[%s1347_s21 + $0x2c0] sm:$0xff] %v512_v53  ;;  %769 = vst [vmem:[%s1347_s21 + $0x2c8] sm:$0xff] %v513_v54  ;;  %v536_v38 = vmul.f32 %v1331_v1, %v279_v35  ;;  %v537_v39 = vmul.f32 %v1331_v1, %v280_v36  ;;  %v281_v40 = vld [vmem:[%s1324_s6 + $0x390] sm:$0xff]  ;;  %v282_v41 = vld [vmem:[%s1324_s6 + $0x398] sm:$0xff] }
  0x70   : > { %770 = vst [vmem:[%s1347_s21 + $0x2d0] sm:$0xff] %v514_v58  ;;  %771 = vst [vmem:[%s1347_s21 + $0x2d8] sm:$0xff] %v515_v59  ;;  %v283_v42 = vld [vmem:[%s1324_s6 + $0x3a0] sm:$0xff]  ;;  %v538_v43 = vmul.f32 %v1331_v1, %v281_v40  ;;  %v539_v44 = vmul.f32 %v1331_v1, %v282_v41  ;;  %v284_v46 = vld [vmem:[%s1324_s6 + $0x3a8] sm:$0xff] }
  0x71   : > { %772 = vst [vmem:[%s1347_s21 + $0x2e0] sm:$0xff] %v516_v60  ;;  %773 = vst [vmem:[%s1347_s21 + $0x2e8] sm:$0xff] %v517_v0  ;;  %v540_v45 = vmul.f32 %v1331_v1, %v283_v42  ;;  %v285_v47 = vld [vmem:[%s1324_s6 + $0x3b0] sm:$0xff]  ;;  %v286_v48 = vld [vmem:[%s1324_s6 + $0x3b8] sm:$0xff]  ;;  %v541_v49 = vmul.f32 %v1331_v1, %v284_v46 }
  0x72   : > { %774 = vst [vmem:[%s1347_s21 + $0x2f0] sm:$0xff] %v518_v2  ;;  %775 = vst [vmem:[%s1347_s21 + $0x2f8] sm:$0xff] %v519_v3  ;;  %v542_v50 = vmul.f32 %v1331_v1, %v285_v47  ;;  %v543_v51 = vmul.f32 %v1331_v1, %v286_v48  ;;  %v287_v52 = vld [vmem:[%s1324_s6 + $0x3c0] sm:$0xff]  ;;  %v288_v53 = vld [vmem:[%s1324_s6 + $0x3c8] sm:$0xff] }
  0x73   : > { %776 = vst [vmem:[%s1347_s21 + $0x300] sm:$0xff] %v520_v7  ;;  %777 = vst [vmem:[%s1347_s21 + $0x308] sm:$0xff] %v521_v8  ;;  %v289_v54 = vld [vmem:[%s1324_s6 + $0x3d0] sm:$0xff]  ;;  %v544_v55 = vmul.f32 %v1331_v1, %v287_v52  ;;  %v545_v56 = vmul.f32 %v1331_v1, %v288_v53  ;;  %v290_v58 = vld [vmem:[%s1324_s6 + $0x3d8] sm:$0xff] }
  0x74   : > { %778 = vst [vmem:[%s1347_s21 + $0x310] sm:$0xff] %v522_v9  ;;  %779 = vst [vmem:[%s1347_s21 + $0x318] sm:$0xff] %v523_v13  ;;  %v546_v57 = vmul.f32 %v1331_v1, %v289_v54  ;;  %v291_v59 = vld [vmem:[%s1324_s6 + $0x3e0] sm:$0xff]  ;;  %v292_v60 = vld [vmem:[%s1324_s6 + $0x3e8] sm:$0xff]  ;;  %v547_v61 = vmul.f32 %v1331_v1, %v290_v58 }
  0x75   : > { %780 = vst [vmem:[%s1347_s21 + $0x320] sm:$0xff] %v524_v14  ;;  %781 = vst [vmem:[%s1347_s21 + $0x328] sm:$0xff] %v525_v15  ;;  %v548_v62 = vmul.f32 %v1331_v1, %v291_v59  ;;  %v549_v63 = vmul.f32 %v1331_v1, %v292_v60  ;;  %v293_v0 = vld [vmem:[%s1324_s6 + $0x3f0] sm:$0xff]  ;;  %v294_v2 = vld [vmem:[%s1324_s6 + $0x3f8] sm:$0xff] }
  0x76   : > { %782 = vst [vmem:[%s1347_s21 + $0x330] sm:$0xff] %v526_v19  ;;  %783 = vst [vmem:[%s1347_s21 + $0x338] sm:$0xff] %v527_v20  ;;  %v295_v3 = vld [vmem:[%s1324_s6 + $0x400] sm:$0xff]  ;;  %v550_v4 = vmul.f32 %v1331_v1, %v293_v0  ;;  %v551_v5 = vmul.f32 %v1331_v1, %v294_v2  ;;  %v296_v7 = vld [vmem:[%s1324_s6 + $0x408] sm:$0xff] }
  0x77   : > { %784 = vst [vmem:[%s1347_s21 + $0x340] sm:$0xff] %v528_v21  ;;  %785 = vst [vmem:[%s1347_s21 + $0x348] sm:$0xff] %v529_v25  ;;  %v552_v6 = vmul.f32 %v1331_v1, %v295_v3  ;;  %v297_v8 = vld [vmem:[%s1324_s6 + $0x410] sm:$0xff]  ;;  %v298_v9 = vld [vmem:[%s1324_s6 + $0x418] sm:$0xff]  ;;  %v553_v10 = vmul.f32 %v1331_v1, %v296_v7 }
  0x78   : > { %786 = vst [vmem:[%s1347_s21 + $0x350] sm:$0xff] %v530_v26  ;;  %787 = vst [vmem:[%s1347_s21 + $0x358] sm:$0xff] %v531_v27  ;;  %v554_v11 = vmul.f32 %v1331_v1, %v297_v8  ;;  %v555_v12 = vmul.f32 %v1331_v1, %v298_v9  ;;  %v299_v13 = vld [vmem:[%s1324_s6 + $0x420] sm:$0xff]  ;;  %v300_v14 = vld [vmem:[%s1324_s6 + $0x428] sm:$0xff] }
  0x79   : > { %788 = vst [vmem:[%s1347_s21 + $0x360] sm:$0xff] %v532_v31  ;;  %789 = vst [vmem:[%s1347_s21 + $0x368] sm:$0xff] %v533_v32  ;;  %v301_v15 = vld [vmem:[%s1324_s6 + $0x430] sm:$0xff]  ;;  %v556_v16 = vmul.f32 %v1331_v1, %v299_v13  ;;  %v557_v17 = vmul.f32 %v1331_v1, %v300_v14  ;;  %v302_v19 = vld [vmem:[%s1324_s6 + $0x438] sm:$0xff] }
  0x7a   : > { %790 = vst [vmem:[%s1347_s21 + $0x370] sm:$0xff] %v534_v33  ;;  %791 = vst [vmem:[%s1347_s21 + $0x378] sm:$0xff] %v535_v37  ;;  %v558_v18 = vmul.f32 %v1331_v1, %v301_v15  ;;  %v303_v20 = vld [vmem:[%s1324_s6 + $0x440] sm:$0xff]  ;;  %v304_v21 = vld [vmem:[%s1324_s6 + $0x448] sm:$0xff]  ;;  %v559_v22 = vmul.f32 %v1331_v1, %v302_v19 }
  0x7b   : > { %792 = vst [vmem:[%s1347_s21 + $0x380] sm:$0xff] %v536_v38  ;;  %793 = vst [vmem:[%s1347_s21 + $0x388] sm:$0xff] %v537_v39  ;;  %v560_v23 = vmul.f32 %v1331_v1, %v303_v20  ;;  %v561_v24 = vmul.f32 %v1331_v1, %v304_v21  ;;  %v305_v25 = vld [vmem:[%s1324_s6 + $0x450] sm:$0xff]  ;;  %v306_v26 = vld [vmem:[%s1324_s6 + $0x458] sm:$0xff] }
  0x7c   : > { %794 = vst [vmem:[%s1347_s21 + $0x390] sm:$0xff] %v538_v43  ;;  %795 = vst [vmem:[%s1347_s21 + $0x398] sm:$0xff] %v539_v44  ;;  %v307_v27 = vld [vmem:[%s1324_s6 + $0x460] sm:$0xff]  ;;  %v562_v28 = vmul.f32 %v1331_v1, %v305_v25  ;;  %v563_v29 = vmul.f32 %v1331_v1, %v306_v26  ;;  %v308_v31 = vld [vmem:[%s1324_s6 + $0x468] sm:$0xff] }
  0x7d   : > { %796 = vst [vmem:[%s1347_s21 + $0x3a0] sm:$0xff] %v540_v45  ;;  %797 = vst [vmem:[%s1347_s21 + $0x3a8] sm:$0xff] %v541_v49  ;;  %v564_v30 = vmul.f32 %v1331_v1, %v307_v27  ;;  %v309_v32 = vld [vmem:[%s1324_s6 + $0x470] sm:$0xff]  ;;  %v310_v33 = vld [vmem:[%s1324_s6 + $0x478] sm:$0xff]  ;;  %v565_v34 = vmul.f32 %v1331_v1, %v308_v31 }
  0x7e   : > { %798 = vst [vmem:[%s1347_s21 + $0x3b0] sm:$0xff] %v542_v50  ;;  %799 = vst [vmem:[%s1347_s21 + $0x3b8] sm:$0xff] %v543_v51  ;;  %v566_v35 = vmul.f32 %v1331_v1, %v309_v32  ;;  %v567_v36 = vmul.f32 %v1331_v1, %v310_v33  ;;  %v311_v37 = vld [vmem:[%s1324_s6 + $0x480] sm:$0xff]  ;;  %v312_v38 = vld [vmem:[%s1324_s6 + $0x488] sm:$0xff] }
  0x7f   : > { %800 = vst [vmem:[%s1347_s21 + $0x3c0] sm:$0xff] %v544_v55  ;;  %801 = vst [vmem:[%s1347_s21 + $0x3c8] sm:$0xff] %v545_v56  ;;  %v313_v39 = vld [vmem:[%s1324_s6 + $0x490] sm:$0xff]  ;;  %v568_v40 = vmul.f32 %v1331_v1, %v311_v37  ;;  %v569_v41 = vmul.f32 %v1331_v1, %v312_v38  ;;  %v314_v43 = vld [vmem:[%s1324_s6 + $0x498] sm:$0xff] }
  0x80   : > { %802 = vst [vmem:[%s1347_s21 + $0x3d0] sm:$0xff] %v546_v57  ;;  %803 = vst [vmem:[%s1347_s21 + $0x3d8] sm:$0xff] %v547_v61  ;;  %v570_v42 = vmul.f32 %v1331_v1, %v313_v39  ;;  %v315_v44 = vld [vmem:[%s1324_s6 + $0x4a0] sm:$0xff]  ;;  %v316_v45 = vld [vmem:[%s1324_s6 + $0x4a8] sm:$0xff]  ;;  %v571_v46 = vmul.f32 %v1331_v1, %v314_v43 }
  0x81   : > { %804 = vst [vmem:[%s1347_s21 + $0x3e0] sm:$0xff] %v548_v62  ;;  %805 = vst [vmem:[%s1347_s21 + $0x3e8] sm:$0xff] %v549_v63  ;;  %v572_v47 = vmul.f32 %v1331_v1, %v315_v44  ;;  %v573_v48 = vmul.f32 %v1331_v1, %v316_v45  ;;  %v317_v49 = vld [vmem:[%s1324_s6 + $0x4b0] sm:$0xff]  ;;  %v318_v50 = vld [vmem:[%s1324_s6 + $0x4b8] sm:$0xff] }
  0x82   : > { %806 = vst [vmem:[%s1347_s21 + $0x3f0] sm:$0xff] %v550_v4  ;;  %807 = vst [vmem:[%s1347_s21 + $0x3f8] sm:$0xff] %v551_v5  ;;  %v319_v51 = vld [vmem:[%s1324_s6 + $0x4c0] sm:$0xff]  ;;  %v574_v52 = vmul.f32 %v1331_v1, %v317_v49  ;;  %v575_v53 = vmul.f32 %v1331_v1, %v318_v50  ;;  %v320_v55 = vld [vmem:[%s1324_s6 + $0x4c8] sm:$0xff] }
  0x83   : > { %808 = vst [vmem:[%s1347_s21 + $0x400] sm:$0xff] %v552_v6  ;;  %809 = vst [vmem:[%s1347_s21 + $0x408] sm:$0xff] %v553_v10  ;;  %v576_v54 = vmul.f32 %v1331_v1, %v319_v51  ;;  %v321_v56 = vld [vmem:[%s1324_s6 + $0x4d0] sm:$0xff]  ;;  %v322_v57 = vld [vmem:[%s1324_s6 + $0x4d8] sm:$0xff]  ;;  %v577_v58 = vmul.f32 %v1331_v1, %v320_v55 }
  0x84   : > { %810 = vst [vmem:[%s1347_s21 + $0x410] sm:$0xff] %v554_v11  ;;  %811 = vst [vmem:[%s1347_s21 + $0x418] sm:$0xff] %v555_v12  ;;  %v578_v59 = vmul.f32 %v1331_v1, %v321_v56  ;;  %v579_v60 = vmul.f32 %v1331_v1, %v322_v57  ;;  %v323_v61 = vld [vmem:[%s1324_s6 + $0x4e0] sm:$0xff]  ;;  %v324_v62 = vld [vmem:[%s1324_s6 + $0x4e8] sm:$0xff] }
  0x85   : > { %812 = vst [vmem:[%s1347_s21 + $0x420] sm:$0xff] %v556_v16  ;;  %813 = vst [vmem:[%s1347_s21 + $0x428] sm:$0xff] %v557_v17  ;;  %v325_v63 = vld [vmem:[%s1324_s6 + $0x4f0] sm:$0xff]  ;;  %v580_v0 = vmul.f32 %v1331_v1, %v323_v61  ;;  %v581_v2 = vmul.f32 %v1331_v1, %v324_v62  ;;  %v326_v4 = vld [vmem:[%s1324_s6 + $0x4f8] sm:$0xff] }
  0x86   : > { %814 = vst [vmem:[%s1347_s21 + $0x430] sm:$0xff] %v558_v18  ;;  %815 = vst [vmem:[%s1347_s21 + $0x438] sm:$0xff] %v559_v22  ;;  %v582_v3 = vmul.f32 %v1331_v1, %v325_v63  ;;  %v327_v5 = vld [vmem:[%s1324_s6 + $0x500] sm:$0xff]  ;;  %v328_v6 = vld [vmem:[%s1324_s6 + $0x508] sm:$0xff]  ;;  %v583_v7 = vmul.f32 %v1331_v1, %v326_v4 }
  0x87   : > { %816 = vst [vmem:[%s1347_s21 + $0x440] sm:$0xff] %v560_v23  ;;  %817 = vst [vmem:[%s1347_s21 + $0x448] sm:$0xff] %v561_v24  ;;  %v584_v8 = vmul.f32 %v1331_v1, %v327_v5  ;;  %v585_v9 = vmul.f32 %v1331_v1, %v328_v6  ;;  %v329_v10 = vld [vmem:[%s1324_s6 + $0x510] sm:$0xff]  ;;  %v330_v11 = vld [vmem:[%s1324_s6 + $0x518] sm:$0xff] }
  0x88   : > { %818 = vst [vmem:[%s1347_s21 + $0x450] sm:$0xff] %v562_v28  ;;  %819 = vst [vmem:[%s1347_s21 + $0x458] sm:$0xff] %v563_v29  ;;  %v331_v12 = vld [vmem:[%s1324_s6 + $0x520] sm:$0xff]  ;;  %v586_v13 = vmul.f32 %v1331_v1, %v329_v10  ;;  %v587_v14 = vmul.f32 %v1331_v1, %v330_v11  ;;  %v332_v16 = vld [vmem:[%s1324_s6 + $0x528] sm:$0xff] }
  0x89   : > { %820 = vst [vmem:[%s1347_s21 + $0x460] sm:$0xff] %v564_v30  ;;  %821 = vst [vmem:[%s1347_s21 + $0x468] sm:$0xff] %v565_v34  ;;  %v588_v15 = vmul.f32 %v1331_v1, %v331_v12  ;;  %v333_v17 = vld [vmem:[%s1324_s6 + $0x530] sm:$0xff]  ;;  %v334_v18 = vld [vmem:[%s1324_s6 + $0x538] sm:$0xff]  ;;  %v589_v19 = vmul.f32 %v1331_v1, %v332_v16 }
  0x8a   : > { %822 = vst [vmem:[%s1347_s21 + $0x470] sm:$0xff] %v566_v35  ;;  %823 = vst [vmem:[%s1347_s21 + $0x478] sm:$0xff] %v567_v36  ;;  %v590_v20 = vmul.f32 %v1331_v1, %v333_v17  ;;  %v591_v21 = vmul.f32 %v1331_v1, %v334_v18  ;;  %v335_v22 = vld [vmem:[%s1324_s6 + $0x540] sm:$0xff]  ;;  %v336_v23 = vld [vmem:[%s1324_s6 + $0x548] sm:$0xff] }
  0x8b   : > { %824 = vst [vmem:[%s1347_s21 + $0x480] sm:$0xff] %v568_v40  ;;  %825 = vst [vmem:[%s1347_s21 + $0x488] sm:$0xff] %v569_v41  ;;  %v337_v24 = vld [vmem:[%s1324_s6 + $0x550] sm:$0xff]  ;;  %v592_v25 = vmul.f32 %v1331_v1, %v335_v22  ;;  %v593_v26 = vmul.f32 %v1331_v1, %v336_v23  ;;  %v338_v28 = vld [vmem:[%s1324_s6 + $0x558] sm:$0xff] }
  0x8c   : > { %826 = vst [vmem:[%s1347_s21 + $0x490] sm:$0xff] %v570_v42  ;;  %827 = vst [vmem:[%s1347_s21 + $0x498] sm:$0xff] %v571_v46  ;;  %v594_v27 = vmul.f32 %v1331_v1, %v337_v24  ;;  %v339_v29 = vld [vmem:[%s1324_s6 + $0x560] sm:$0xff]  ;;  %v340_v30 = vld [vmem:[%s1324_s6 + $0x568] sm:$0xff]  ;;  %v595_v31 = vmul.f32 %v1331_v1, %v338_v28 }
  0x8d   : > { %828 = vst [vmem:[%s1347_s21 + $0x4a0] sm:$0xff] %v572_v47  ;;  %829 = vst [vmem:[%s1347_s21 + $0x4a8] sm:$0xff] %v573_v48  ;;  %v596_v32 = vmul.f32 %v1331_v1, %v339_v29  ;;  %v597_v33 = vmul.f32 %v1331_v1, %v340_v30  ;;  %v341_v34 = vld [vmem:[%s1324_s6 + $0x570] sm:$0xff]  ;;  %v342_v35 = vld [vmem:[%s1324_s6 + $0x578] sm:$0xff] }
  0x8e   : > { %830 = vst [vmem:[%s1347_s21 + $0x4b0] sm:$0xff] %v574_v52  ;;  %831 = vst [vmem:[%s1347_s21 + $0x4b8] sm:$0xff] %v575_v53  ;;  %v343_v36 = vld [vmem:[%s1324_s6 + $0x580] sm:$0xff]  ;;  %v598_v37 = vmul.f32 %v1331_v1, %v341_v34  ;;  %v599_v38 = vmul.f32 %v1331_v1, %v342_v35  ;;  %v344_v40 = vld [vmem:[%s1324_s6 + $0x588] sm:$0xff] }
  0x8f   : > { %832 = vst [vmem:[%s1347_s21 + $0x4c0] sm:$0xff] %v576_v54  ;;  %833 = vst [vmem:[%s1347_s21 + $0x4c8] sm:$0xff] %v577_v58  ;;  %v600_v39 = vmul.f32 %v1331_v1, %v343_v36  ;;  %v345_v41 = vld [vmem:[%s1324_s6 + $0x590] sm:$0xff]  ;;  %v346_v42 = vld [vmem:[%s1324_s6 + $0x598] sm:$0xff]  ;;  %v601_v43 = vmul.f32 %v1331_v1, %v344_v40 }
  0x90   : > { %834 = vst [vmem:[%s1347_s21 + $0x4d0] sm:$0xff] %v578_v59  ;;  %835 = vst [vmem:[%s1347_s21 + $0x4d8] sm:$0xff] %v579_v60  ;;  %v602_v44 = vmul.f32 %v1331_v1, %v345_v41  ;;  %v603_v45 = vmul.f32 %v1331_v1, %v346_v42  ;;  %v347_v46 = vld [vmem:[%s1324_s6 + $0x5a0] sm:$0xff]  ;;  %v348_v47 = vld [vmem:[%s1324_s6 + $0x5a8] sm:$0xff] }
  0x91   : > { %836 = vst [vmem:[%s1347_s21 + $0x4e0] sm:$0xff] %v580_v0  ;;  %837 = vst [vmem:[%s1347_s21 + $0x4e8] sm:$0xff] %v581_v2  ;;  %v349_v48 = vld [vmem:[%s1324_s6 + $0x5b0] sm:$0xff]  ;;  %v604_v49 = vmul.f32 %v1331_v1, %v347_v46  ;;  %v605_v50 = vmul.f32 %v1331_v1, %v348_v47  ;;  %v350_v52 = vld [vmem:[%s1324_s6 + $0x5b8] sm:$0xff] }
  0x92   : > { %838 = vst [vmem:[%s1347_s21 + $0x4f0] sm:$0xff] %v582_v3  ;;  %839 = vst [vmem:[%s1347_s21 + $0x4f8] sm:$0xff] %v583_v7  ;;  %v606_v51 = vmul.f32 %v1331_v1, %v349_v48  ;;  %v351_v53 = vld [vmem:[%s1324_s6 + $0x5c0] sm:$0xff]  ;;  %v352_v54 = vld [vmem:[%s1324_s6 + $0x5c8] sm:$0xff]  ;;  %v607_v55 = vmul.f32 %v1331_v1, %v350_v52 }
  0x93   : > { %840 = vst [vmem:[%s1347_s21 + $0x500] sm:$0xff] %v584_v8  ;;  %841 = vst [vmem:[%s1347_s21 + $0x508] sm:$0xff] %v585_v9  ;;  %v608_v56 = vmul.f32 %v1331_v1, %v351_v53  ;;  %v609_v57 = vmul.f32 %v1331_v1, %v352_v54  ;;  %v353_v58 = vld [vmem:[%s1324_s6 + $0x5d0] sm:$0xff]  ;;  %v354_v59 = vld [vmem:[%s1324_s6 + $0x5d8] sm:$0xff] }
  0x94   : > { %842 = vst [vmem:[%s1347_s21 + $0x510] sm:$0xff] %v586_v13  ;;  %843 = vst [vmem:[%s1347_s21 + $0x518] sm:$0xff] %v587_v14  ;;  %v355_v60 = vld [vmem:[%s1324_s6 + $0x5e0] sm:$0xff]  ;;  %v610_v61 = vmul.f32 %v1331_v1, %v353_v58  ;;  %v611_v62 = vmul.f32 %v1331_v1, %v354_v59  ;;  %v356_v0 = vld [vmem:[%s1324_s6 + $0x5e8] sm:$0xff] }
  0x95   : > { %844 = vst [vmem:[%s1347_s21 + $0x520] sm:$0xff] %v588_v15  ;;  %845 = vst [vmem:[%s1347_s21 + $0x528] sm:$0xff] %v589_v19  ;;  %v612_v63 = vmul.f32 %v1331_v1, %v355_v60  ;;  %v357_v2 = vld [vmem:[%s1324_s6 + $0x5f0] sm:$0xff]  ;;  %v358_v3 = vld [vmem:[%s1324_s6 + $0x5f8] sm:$0xff]  ;;  %v613_v4 = vmul.f32 %v1331_v1, %v356_v0 }
  0x96   : > { %846 = vst [vmem:[%s1347_s21 + $0x530] sm:$0xff] %v590_v20  ;;  %847 = vst [vmem:[%s1347_s21 + $0x538] sm:$0xff] %v591_v21  ;;  %v614_v5 = vmul.f32 %v1331_v1, %v357_v2  ;;  %v615_v6 = vmul.f32 %v1331_v1, %v358_v3  ;;  %v359_v7 = vld [vmem:[%s1324_s6 + $0x600] sm:$0xff]  ;;  %v360_v8 = vld [vmem:[%s1324_s6 + $0x608] sm:$0xff] }
  0x97   : > { %848 = vst [vmem:[%s1347_s21 + $0x540] sm:$0xff] %v592_v25  ;;  %849 = vst [vmem:[%s1347_s21 + $0x548] sm:$0xff] %v593_v26  ;;  %v361_v9 = vld [vmem:[%s1324_s6 + $0x610] sm:$0xff]  ;;  %v616_v10 = vmul.f32 %v1331_v1, %v359_v7  ;;  %v617_v11 = vmul.f32 %v1331_v1, %v360_v8  ;;  %v362_v13 = vld [vmem:[%s1324_s6 + $0x618] sm:$0xff] }
  0x98   : > { %850 = vst [vmem:[%s1347_s21 + $0x550] sm:$0xff] %v594_v27  ;;  %851 = vst [vmem:[%s1347_s21 + $0x558] sm:$0xff] %v595_v31  ;;  %v618_v12 = vmul.f32 %v1331_v1, %v361_v9  ;;  %v363_v14 = vld [vmem:[%s1324_s6 + $0x620] sm:$0xff]  ;;  %v364_v15 = vld [vmem:[%s1324_s6 + $0x628] sm:$0xff]  ;;  %v619_v16 = vmul.f32 %v1331_v1, %v362_v13 }
  0x99   : > { %852 = vst [vmem:[%s1347_s21 + $0x560] sm:$0xff] %v596_v32  ;;  %853 = vst [vmem:[%s1347_s21 + $0x568] sm:$0xff] %v597_v33  ;;  %v620_v17 = vmul.f32 %v1331_v1, %v363_v14  ;;  %v621_v18 = vmul.f32 %v1331_v1, %v364_v15  ;;  %v365_v19 = vld [vmem:[%s1324_s6 + $0x630] sm:$0xff]  ;;  %v366_v20 = vld [vmem:[%s1324_s6 + $0x638] sm:$0xff] }
  0x9a   : > { %854 = vst [vmem:[%s1347_s21 + $0x570] sm:$0xff] %v598_v37  ;;  %855 = vst [vmem:[%s1347_s21 + $0x578] sm:$0xff] %v599_v38  ;;  %v367_v21 = vld [vmem:[%s1324_s6 + $0x640] sm:$0xff]  ;;  %v622_v22 = vmul.f32 %v1331_v1, %v365_v19  ;;  %v623_v23 = vmul.f32 %v1331_v1, %v366_v20  ;;  %v368_v25 = vld [vmem:[%s1324_s6 + $0x648] sm:$0xff] }
  0x9b   : > { %856 = vst [vmem:[%s1347_s21 + $0x580] sm:$0xff] %v600_v39  ;;  %857 = vst [vmem:[%s1347_s21 + $0x588] sm:$0xff] %v601_v43  ;;  %v624_v24 = vmul.f32 %v1331_v1, %v367_v21  ;;  %v369_v26 = vld [vmem:[%s1324_s6 + $0x650] sm:$0xff]  ;;  %v370_v27 = vld [vmem:[%s1324_s6 + $0x658] sm:$0xff]  ;;  %v625_v28 = vmul.f32 %v1331_v1, %v368_v25 }
  0x9c   : > { %858 = vst [vmem:[%s1347_s21 + $0x590] sm:$0xff] %v602_v44  ;;  %859 = vst [vmem:[%s1347_s21 + $0x598] sm:$0xff] %v603_v45  ;;  %v626_v29 = vmul.f32 %v1331_v1, %v369_v26  ;;  %v627_v30 = vmul.f32 %v1331_v1, %v370_v27  ;;  %v371_v31 = vld [vmem:[%s1324_s6 + $0x660] sm:$0xff]  ;;  %v372_v32 = vld [vmem:[%s1324_s6 + $0x668] sm:$0xff] }
  0x9d   : > { %860 = vst [vmem:[%s1347_s21 + $0x5a0] sm:$0xff] %v604_v49  ;;  %861 = vst [vmem:[%s1347_s21 + $0x5a8] sm:$0xff] %v605_v50  ;;  %v373_v33 = vld [vmem:[%s1324_s6 + $0x670] sm:$0xff]  ;;  %v628_v34 = vmul.f32 %v1331_v1, %v371_v31  ;;  %v629_v35 = vmul.f32 %v1331_v1, %v372_v32  ;;  %v374_v37 = vld [vmem:[%s1324_s6 + $0x678] sm:$0xff] }
  0x9e   : > { %862 = vst [vmem:[%s1347_s21 + $0x5b0] sm:$0xff] %v606_v51  ;;  %863 = vst [vmem:[%s1347_s21 + $0x5b8] sm:$0xff] %v607_v55  ;;  %v630_v36 = vmul.f32 %v1331_v1, %v373_v33  ;;  %v375_v38 = vld [vmem:[%s1324_s6 + $0x680] sm:$0xff]  ;;  %v376_v39 = vld [vmem:[%s1324_s6 + $0x688] sm:$0xff]  ;;  %v631_v40 = vmul.f32 %v1331_v1, %v374_v37 }
  0x9f   : > { %864 = vst [vmem:[%s1347_s21 + $0x5c0] sm:$0xff] %v608_v56  ;;  %865 = vst [vmem:[%s1347_s21 + $0x5c8] sm:$0xff] %v609_v57  ;;  %v632_v41 = vmul.f32 %v1331_v1, %v375_v38  ;;  %v633_v42 = vmul.f32 %v1331_v1, %v376_v39  ;;  %v377_v43 = vld [vmem:[%s1324_s6 + $0x690] sm:$0xff]  ;;  %v378_v44 = vld [vmem:[%s1324_s6 + $0x698] sm:$0xff] }
  0xa0   : > { %866 = vst [vmem:[%s1347_s21 + $0x5d0] sm:$0xff] %v610_v61  ;;  %867 = vst [vmem:[%s1347_s21 + $0x5d8] sm:$0xff] %v611_v62  ;;  %v379_v45 = vld [vmem:[%s1324_s6 + $0x6a0] sm:$0xff]  ;;  %v634_v46 = vmul.f32 %v1331_v1, %v377_v43  ;;  %v635_v47 = vmul.f32 %v1331_v1, %v378_v44  ;;  %v380_v49 = vld [vmem:[%s1324_s6 + $0x6a8] sm:$0xff] }
  0xa1   : > { %868 = vst [vmem:[%s1347_s21 + $0x5e0] sm:$0xff] %v612_v63  ;;  %869 = vst [vmem:[%s1347_s21 + $0x5e8] sm:$0xff] %v613_v4  ;;  %v636_v48 = vmul.f32 %v1331_v1, %v379_v45  ;;  %v381_v50 = vld [vmem:[%s1324_s6 + $0x6b0] sm:$0xff]  ;;  %v382_v51 = vld [vmem:[%s1324_s6 + $0x6b8] sm:$0xff]  ;;  %v637_v52 = vmul.f32 %v1331_v1, %v380_v49 }
  0xa2   : > { %870 = vst [vmem:[%s1347_s21 + $0x5f0] sm:$0xff] %v614_v5  ;;  %871 = vst [vmem:[%s1347_s21 + $0x5f8] sm:$0xff] %v615_v6  ;;  %v638_v53 = vmul.f32 %v1331_v1, %v381_v50  ;;  %v639_v54 = vmul.f32 %v1331_v1, %v382_v51  ;;  %v383_v55 = vld [vmem:[%s1324_s6 + $0x6c0] sm:$0xff]  ;;  %v384_v56 = vld [vmem:[%s1324_s6 + $0x6c8] sm:$0xff] }
  0xa3   : > { %872 = vst [vmem:[%s1347_s21 + $0x600] sm:$0xff] %v616_v10  ;;  %873 = vst [vmem:[%s1347_s21 + $0x608] sm:$0xff] %v617_v11  ;;  %v385_v57 = vld [vmem:[%s1324_s6 + $0x6d0] sm:$0xff]  ;;  %v640_v58 = vmul.f32 %v1331_v1, %v383_v55  ;;  %v641_v59 = vmul.f32 %v1331_v1, %v384_v56  ;;  %v386_v61 = vld [vmem:[%s1324_s6 + $0x6d8] sm:$0xff] }
  0xa4   : > { %874 = vst [vmem:[%s1347_s21 + $0x610] sm:$0xff] %v618_v12  ;;  %875 = vst [vmem:[%s1347_s21 + $0x618] sm:$0xff] %v619_v16  ;;  %v642_v60 = vmul.f32 %v1331_v1, %v385_v57  ;;  %v387_v62 = vld [vmem:[%s1324_s6 + $0x6e0] sm:$0xff]  ;;  %v388_v63 = vld [vmem:[%s1324_s6 + $0x6e8] sm:$0xff]  ;;  %v643_v0 = vmul.f32 %v1331_v1, %v386_v61 }
  0xa5   : > { %876 = vst [vmem:[%s1347_s21 + $0x620] sm:$0xff] %v620_v17  ;;  %877 = vst [vmem:[%s1347_s21 + $0x628] sm:$0xff] %v621_v18  ;;  %v644_v2 = vmul.f32 %v1331_v1, %v387_v62  ;;  %v645_v3 = vmul.f32 %v1331_v1, %v388_v63  ;;  %v389_v4 = vld [vmem:[%s1324_s6 + $0x6f0] sm:$0xff]  ;;  %v390_v5 = vld [vmem:[%s1324_s6 + $0x6f8] sm:$0xff] }
  0xa6   : > { %878 = vst [vmem:[%s1347_s21 + $0x630] sm:$0xff] %v622_v22  ;;  %879 = vst [vmem:[%s1347_s21 + $0x638] sm:$0xff] %v623_v23  ;;  %v391_v6 = vld [vmem:[%s1324_s6 + $0x700] sm:$0xff]  ;;  %v646_v7 = vmul.f32 %v1331_v1, %v389_v4  ;;  %v647_v8 = vmul.f32 %v1331_v1, %v390_v5  ;;  %v392_v10 = vld [vmem:[%s1324_s6 + $0x708] sm:$0xff] }
  0xa7   : > { %880 = vst [vmem:[%s1347_s21 + $0x640] sm:$0xff] %v624_v24  ;;  %881 = vst [vmem:[%s1347_s21 + $0x648] sm:$0xff] %v625_v28  ;;  %v648_v9 = vmul.f32 %v1331_v1, %v391_v6  ;;  %v393_v11 = vld [vmem:[%s1324_s6 + $0x710] sm:$0xff]  ;;  %v394_v12 = vld [vmem:[%s1324_s6 + $0x718] sm:$0xff]  ;;  %v649_v13 = vmul.f32 %v1331_v1, %v392_v10 }
  0xa8   : > { %882 = vst [vmem:[%s1347_s21 + $0x650] sm:$0xff] %v626_v29  ;;  %883 = vst [vmem:[%s1347_s21 + $0x658] sm:$0xff] %v627_v30  ;;  %v650_v14 = vmul.f32 %v1331_v1, %v393_v11  ;;  %v651_v15 = vmul.f32 %v1331_v1, %v394_v12  ;;  %v395_v16 = vld [vmem:[%s1324_s6 + $0x720] sm:$0xff]  ;;  %v396_v17 = vld [vmem:[%s1324_s6 + $0x728] sm:$0xff] }
  0xa9   : > { %884 = vst [vmem:[%s1347_s21 + $0x660] sm:$0xff] %v628_v34  ;;  %885 = vst [vmem:[%s1347_s21 + $0x668] sm:$0xff] %v629_v35  ;;  %v397_v18 = vld [vmem:[%s1324_s6 + $0x730] sm:$0xff]  ;;  %v652_v19 = vmul.f32 %v1331_v1, %v395_v16  ;;  %v653_v20 = vmul.f32 %v1331_v1, %v396_v17  ;;  %v398_v22 = vld [vmem:[%s1324_s6 + $0x738] sm:$0xff] }
  0xaa   : > { %886 = vst [vmem:[%s1347_s21 + $0x670] sm:$0xff] %v630_v36  ;;  %887 = vst [vmem:[%s1347_s21 + $0x678] sm:$0xff] %v631_v40  ;;  %v654_v21 = vmul.f32 %v1331_v1, %v397_v18  ;;  %v399_v23 = vld [vmem:[%s1324_s6 + $0x740] sm:$0xff]  ;;  %v400_v24 = vld [vmem:[%s1324_s6 + $0x748] sm:$0xff]  ;;  %v655_v25 = vmul.f32 %v1331_v1, %v398_v22 }
  0xab   : > { %888 = vst [vmem:[%s1347_s21 + $0x680] sm:$0xff] %v632_v41  ;;  %889 = vst [vmem:[%s1347_s21 + $0x688] sm:$0xff] %v633_v42  ;;  %v656_v26 = vmul.f32 %v1331_v1, %v399_v23  ;;  %v657_v27 = vmul.f32 %v1331_v1, %v400_v24  ;;  %v401_v28 = vld [vmem:[%s1324_s6 + $0x750] sm:$0xff]  ;;  %v402_v29 = vld [vmem:[%s1324_s6 + $0x758] sm:$0xff] }
  0xac   : > { %890 = vst [vmem:[%s1347_s21 + $0x690] sm:$0xff] %v634_v46  ;;  %891 = vst [vmem:[%s1347_s21 + $0x698] sm:$0xff] %v635_v47  ;;  %v403_v30 = vld [vmem:[%s1324_s6 + $0x760] sm:$0xff]  ;;  %v658_v31 = vmul.f32 %v1331_v1, %v401_v28  ;;  %v659_v32 = vmul.f32 %v1331_v1, %v402_v29  ;;  %v404_v34 = vld [vmem:[%s1324_s6 + $0x768] sm:$0xff] }
  0xad   : > { %892 = vst [vmem:[%s1347_s21 + $0x6a0] sm:$0xff] %v636_v48  ;;  %893 = vst [vmem:[%s1347_s21 + $0x6a8] sm:$0xff] %v637_v52  ;;  %v660_v33 = vmul.f32 %v1331_v1, %v403_v30  ;;  %v405_v35 = vld [vmem:[%s1324_s6 + $0x770] sm:$0xff]  ;;  %v406_v36 = vld [vmem:[%s1324_s6 + $0x778] sm:$0xff]  ;;  %v661_v37 = vmul.f32 %v1331_v1, %v404_v34 }
  0xae   : > { %894 = vst [vmem:[%s1347_s21 + $0x6b0] sm:$0xff] %v638_v53  ;;  %895 = vst [vmem:[%s1347_s21 + $0x6b8] sm:$0xff] %v639_v54  ;;  %v662_v38 = vmul.f32 %v1331_v1, %v405_v35  ;;  %v663_v39 = vmul.f32 %v1331_v1, %v406_v36  ;;  %v407_v40 = vld [vmem:[%s1324_s6 + $0x780] sm:$0xff]  ;;  %v408_v41 = vld [vmem:[%s1324_s6 + $0x788] sm:$0xff] }
  0xaf   : > { %896 = vst [vmem:[%s1347_s21 + $0x6c0] sm:$0xff] %v640_v58  ;;  %897 = vst [vmem:[%s1347_s21 + $0x6c8] sm:$0xff] %v641_v59  ;;  %v409_v42 = vld [vmem:[%s1324_s6 + $0x790] sm:$0xff]  ;;  %v664_v43 = vmul.f32 %v1331_v1, %v407_v40  ;;  %v665_v44 = vmul.f32 %v1331_v1, %v408_v41  ;;  %v410_v46 = vld [vmem:[%s1324_s6 + $0x798] sm:$0xff] }
  0xb0   : > { %898 = vst [vmem:[%s1347_s21 + $0x6d0] sm:$0xff] %v642_v60  ;;  %899 = vst [vmem:[%s1347_s21 + $0x6d8] sm:$0xff] %v643_v0  ;;  %v666_v45 = vmul.f32 %v1331_v1, %v409_v42  ;;  %v411_v47 = vld [vmem:[%s1324_s6 + $0x7a0] sm:$0xff]  ;;  %v412_v48 = vld [vmem:[%s1324_s6 + $0x7a8] sm:$0xff]  ;;  %v667_v49 = vmul.f32 %v1331_v1, %v410_v46 }
  0xb1   : > { %900 = vst [vmem:[%s1347_s21 + $0x6e0] sm:$0xff] %v644_v2  ;;  %901 = vst [vmem:[%s1347_s21 + $0x6e8] sm:$0xff] %v645_v3  ;;  %v668_v50 = vmul.f32 %v1331_v1, %v411_v47  ;;  %v669_v51 = vmul.f32 %v1331_v1, %v412_v48  ;;  %v413_v52 = vld [vmem:[%s1324_s6 + $0x7b0] sm:$0xff]  ;;  %v414_v53 = vld [vmem:[%s1324_s6 + $0x7b8] sm:$0xff] }
  0xb2   : > { %902 = vst [vmem:[%s1347_s21 + $0x6f0] sm:$0xff] %v646_v7  ;;  %903 = vst [vmem:[%s1347_s21 + $0x6f8] sm:$0xff] %v647_v8  ;;  %v415_v54 = vld [vmem:[%s1324_s6 + $0x7c0] sm:$0xff]  ;;  %v670_v55 = vmul.f32 %v1331_v1, %v413_v52  ;;  %v671_v56 = vmul.f32 %v1331_v1, %v414_v53  ;;  %v416_v58 = vld [vmem:[%s1324_s6 + $0x7c8] sm:$0xff] }
  0xb3   : > { %904 = vst [vmem:[%s1347_s21 + $0x700] sm:$0xff] %v648_v9  ;;  %905 = vst [vmem:[%s1347_s21 + $0x708] sm:$0xff] %v649_v13  ;;  %v672_v57 = vmul.f32 %v1331_v1, %v415_v54  ;;  %v417_v59 = vld [vmem:[%s1324_s6 + $0x7d0] sm:$0xff]  ;;  %v418_v60 = vld [vmem:[%s1324_s6 + $0x7d8] sm:$0xff]  ;;  %v673_v61 = vmul.f32 %v1331_v1, %v416_v58 }
  0xb4   : > { %906 = vst [vmem:[%s1347_s21 + $0x710] sm:$0xff] %v650_v14  ;;  %907 = vst [vmem:[%s1347_s21 + $0x718] sm:$0xff] %v651_v15  ;;  %v674_v62 = vmul.f32 %v1331_v1, %v417_v59  ;;  %v675_v63 = vmul.f32 %v1331_v1, %v418_v60  ;;  %v419_v0 = vld [vmem:[%s1324_s6 + $0x7e0] sm:$0xff]  ;;  %v420_v2 = vld [vmem:[%s1324_s6 + $0x7e8] sm:$0xff] }
  0xb5   : > { %908 = vst [vmem:[%s1347_s21 + $0x720] sm:$0xff] %v652_v19  ;;  %909 = vst [vmem:[%s1347_s21 + $0x728] sm:$0xff] %v653_v20  ;;  %v421_v3 = vld [vmem:[%s1324_s6 + $0x7f0] sm:$0xff]  ;;  %v676_v4 = vmul.f32 %v1331_v1, %v419_v0  ;;  %v677_v5 = vmul.f32 %v1331_v1, %v420_v2  ;;  %v422_v7 = vld [vmem:[%s1324_s6 + $0x7f8] sm:$0xff] }
  0xb6   : > { %910 = vst [vmem:[%s1347_s21 + $0x730] sm:$0xff] %v654_v21  ;;  %911 = vst [vmem:[%s1347_s21 + $0x738] sm:$0xff] %v655_v25  ;;  %v678_v6 = vmul.f32 %v1331_v1, %v421_v3  ;;  %v679_v8 = vmul.f32 %v1331_v1, %v422_v7 }
  0xb7   : > { %912 = vst [vmem:[%s1347_s21 + $0x740] sm:$0xff] %v656_v26  ;;  %913 = vst [vmem:[%s1347_s21 + $0x748] sm:$0xff] %v657_v27 }
  0xb8   : > { %914 = vst [vmem:[%s1347_s21 + $0x750] sm:$0xff] %v658_v31  ;;  %915 = vst [vmem:[%s1347_s21 + $0x758] sm:$0xff] %v659_v32 }
  0xb9   : > { %916 = vst [vmem:[%s1347_s21 + $0x760] sm:$0xff] %v660_v33  ;;  %917 = vst [vmem:[%s1347_s21 + $0x768] sm:$0xff] %v661_v37 }
  0xba   : > { %918 = vst [vmem:[%s1347_s21 + $0x770] sm:$0xff] %v662_v38  ;;  %919 = vst [vmem:[%s1347_s21 + $0x778] sm:$0xff] %v663_v39 }
  0xbb   : > { %920 = vst [vmem:[%s1347_s21 + $0x780] sm:$0xff] %v664_v43  ;;  %921 = vst [vmem:[%s1347_s21 + $0x788] sm:$0xff] %v665_v44 }
  0xbc   : > { %922 = vst [vmem:[%s1347_s21 + $0x790] sm:$0xff] %v666_v45  ;;  %923 = vst [vmem:[%s1347_s21 + $0x798] sm:$0xff] %v667_v49 }
  0xbd   : > { %924 = vst [vmem:[%s1347_s21 + $0x7a0] sm:$0xff] %v668_v50  ;;  %925 = vst [vmem:[%s1347_s21 + $0x7a8] sm:$0xff] %v669_v51 }
  0xbe   : > { %926 = vst [vmem:[%s1347_s21 + $0x7b0] sm:$0xff] %v670_v55  ;;  %927 = vst [vmem:[%s1347_s21 + $0x7b8] sm:$0xff] %v671_v56 }
  0xbf   : > { %928 = vst [vmem:[%s1347_s21 + $0x7c0] sm:$0xff] %v672_v57  ;;  %929 = vst [vmem:[%s1347_s21 + $0x7c8] sm:$0xff] %v673_v61 }
  0xc0   : > { %930 = vst [vmem:[%s1347_s21 + $0x7d0] sm:$0xff] %v674_v62  ;;  %931 = vst [vmem:[%s1347_s21 + $0x7d8] sm:$0xff] %v675_v63 }
  0xc1   : > { %932 = vst [vmem:[%s1347_s21 + $0x7e0] sm:$0xff] %v676_v4  ;;  %933 = vst [vmem:[%s1347_s21 + $0x7e8] sm:$0xff] %v677_v5 }
  0xc2   : > { %934 = vst [vmem:[%s1347_s21 + $0x7f0] sm:$0xff] %v678_v6  ;;  %935 = vst [vmem:[%s1347_s21 + $0x7f8] sm:$0xff] %v679_v8 }
  0xc3   : > { %1137 = shalt.err (!%p1134_p2)
}
  0xc4   : > { %s1138_s18 = scalar_lea.hbm %s2099_s7, 32768  ;;  %s1142_s25 = scalar_lea.hbm %s2155_s2, 65536 }
  0xc5   : > { %p1139_p4 = scmp.ne.s32.totalorder %s2099_s7, %s1138_s18  ;;  %p1143_p9 = scmp.lt.u32.totalorder %s2099_s7, %s2155_s2 }
  0xc6   : > { %p1144_p1 = scmp.lt.u32.totalorder %s1142_s25, %s1138_s18  ;;  %p1146_p6 = scmp.lt.u32.totalorder %s1138_s18, %s2099_s7 }
  0xc7   : > { %p1140_p5 = pnand %p1139_p4, %p2162_p11 }
  0xc8   : > { %p1145_p3 = por %p1144_p1, %p1143_p9 }
  0xc9   : > { %p1141_p7 = pneg %p1140_p5 }
  0xca   : > { %p1147_p12 = por %p1146_p6, %p1145_p3 }
  0xcc   : > { %p1148_p13 = pnand %p1147_p12, %p1141_p7 }
  0xce   : > { %1151 = shalt.err (!%p1148_p13)
}
  0xcf   : > { %s1196_s30 = smov 4096   ;;  %s1197_s6 = smov 256  }
  0xd0   : > { %1046 = dma.vmem_to_hbm [thread:$0]  (%p2162_p11), %s2101_s4, 32768, %s2099_s7, %s937_s8, %s1196_s30, %s1196_s30, %s1197_s6  }
  0xd1 PF: > { %s966_s29 = sand.u32 1, %s1178_s11   ;;  %p2163_p8 = scmp.ne.s32.totalorder %s2160_s23, 0 }
  0xd2   : > { %p2164_p10 = scmp.ge.s32.totalorder %s1190_s14, 2  ;;  %s967_s21 = scalar_lea.sflag [#allocation5], %s966_s29 }
  0xd4   : > { %p1053_p0 = pnand %p2164_p10, %p2163_p8 }
  0xd6   : > { %1173 = dma.done.wait (!%p1053_p0), %s967_s21, 32768  }
  0xd7   : > { %1175 = vsyncadd (!%p1053_p0), %s967_s21, 4294934528  ;;  %p16_p2 = scmp.ge.s32.totalorder %s1241_s16, 4   ;;  %s2165_s11 = smov %s1182_s12 }
  0xd8   : > { %s2166_s12 = smov %s1186_s13  ;;  %s2167_s13 = smov %s1253_s19 }
  0xd9   : > { %s2168_s14 = smov %s1241_s16  ;;  %18 = sbr.rel (!%p16_p2) target bundleno = 7 (0x7), region = 73 }
  0xe0   :  { %972 = vsyncpa [#allocation4], 1 }
  0xe1   :  { %974 = vsyncpa [#allocation4 + $0x1], 1 }
  0xe2   :  { %975 = vsyncpa [#allocation5], 1 }
  0xe3   :  { %977 = vsyncpa [#allocation5 + $0x1], 1 }

</bundles_post_ra>
